<compile_context>
chip_gen: v6e
topology: v6e:2x2x1
jax: 0.10.0
libtpu: 0.0.40
codegen_flags: <defaults>
</compile_context>

<pallas_src>
import functools

import jax
import jax.numpy as jnp
from jax.experimental import pallas as pl
from jax.experimental.pallas import tpu as pltpu

IN_FEATURES = 24      # 8 * 3
HIDDEN = 50
HIDDEN_PAD = 128      # lane-dense hidden width (zero-padded; numerically identical)
OUT_FEATURES = 20

# Lane-padded VMEM bytes per batch row (f32; every (tb, <=128)-wide block fills 128 lanes):
#   x block   (tb,24)->(tb,128) f32 : 512 B, double-buffered -> 1024 B
#   out block (tb,20)->(tb,128) f32 : 512 B, double-buffered -> 1024 B
#   h + matmul temps (tb,128) f32   : ~1024 B
_VMEM_BYTES_PER_ROW = 3 * 1024
_MAX_TILE_B = 8192   # large enough to amortize the ~0.35 us per-grid-step overhead


def _mlp_kernel(x_ref, w1_ref, b1_ref, w2_ref, b2_ref, o_ref):
    # fc1 + ReLU: (tb, 24) @ (24, 128) -> (tb, 128); all f32 (MXU far from the bottleneck).
    h = jnp.dot(x_ref[...], w1_ref[...], preferred_element_type=jnp.float32)
    h = jnp.maximum(h + b1_ref[...], 0.0)
    # fc2: (tb, 128) @ (128, 20) -> (tb, 20); padded rows of w2 are zero (no contribution).
    out = jnp.dot(h, w2_ref[...], preferred_element_type=jnp.float32)
    o_ref[...] = (out + b2_ref[...]).astype(o_ref.dtype)


def pack_params(w1, b1, w2, b2):
    """Zero-pad the hidden dim 50->128 once (not per call).  Everything stays f32.

    w1: (24, 50), b1: (1, 50), w2: (50, 20), b2: (1, 20) -- already (in, out) layout.
    """
    w1p = jnp.zeros((IN_FEATURES, HIDDEN_PAD), jnp.float32).at[:, :HIDDEN].set(
        jnp.asarray(w1, jnp.float32))
    b1p = jnp.zeros((1, HIDDEN_PAD), jnp.float32).at[:, :HIDDEN].set(
        jnp.asarray(b1, jnp.float32))
    w2p = jnp.zeros((HIDDEN_PAD, OUT_FEATURES), jnp.float32).at[:HIDDEN, :].set(
        jnp.asarray(w2, jnp.float32))
    b2p = jnp.asarray(b2, jnp.float32).reshape(1, OUT_FEATURES)
    return w1p, b1p, w2p, b2p


def _round_up(n, m):
    return (n + m - 1) // m * m


def _physical_vmem_bytes():
    try:
        return int(pltpu.get_tpu_info().vmem_capacity_bytes)
    except Exception:
        return 64 << 20  # assume the smallest per-core VMEM (v7x)


def _default_tile_b(phys_vmem):
    # Budget half of physical VMEM for the streamed activation tiles; the remainder covers
    # the VMEM-resident weights, compiler-internal scratch, and safety margin.
    budget_rows = (phys_vmem // 2) // _VMEM_BYTES_PER_ROW
    tb = (min(_MAX_TILE_B, budget_rows) // 8) * 8
    return max(512, tb)


def _vmem_limit_for(tile_b, phys_vmem):
    # Lane-padded activation footprint + weights/compiler-scratch headroom, never above
    # 3/4 of physical VMEM and never below a sane 16 MiB floor.
    want = tile_b * _VMEM_BYTES_PER_ROW + (12 << 20)
    return int(max(16 << 20, min(phys_vmem * 3 // 4, want)))


@functools.partial(
    jax.jit,
    static_argnames=("tile_b", "vmem_limit_bytes", "out_dtype", "core_parallel"))
def _forward_impl(x, w1p, b1p, w2p, b2p, *, tile_b, vmem_limit_bytes, out_dtype,
                  core_parallel):
    B = x.shape[0]
    # Ragged last tile is handled by the grid: OOB input rows are unspecified (harmless,
    # rows are independent) and OOB output rows are clipped on writeback.
    num_tiles = pl.cdiv(B, tile_b)

    weight_bytes = (w1p.size + b1p.size + w2p.size + b2p.size) * 4
    out_itemsize = jnp.dtype(out_dtype).itemsize
    cost = pl.CostEstimate(
        flops=2 * B * (IN_FEATURES * HIDDEN_PAD + HIDDEN_PAD * OUT_FEATURES),
        transcendentals=0,
        bytes_accessed=B * (IN_FEATURES * 4 + OUT_FEATURES * out_itemsize) + weight_bytes,
    )

    batch_sem = pltpu.CORE_PARALLEL if core_parallel else pltpu.PARALLEL

    return pl.pallas_call(
        _mlp_kernel,
        out_shape=jax.ShapeDtypeStruct((B, OUT_FEATURES), out_dtype),
        grid=(num_tiles,),
        in_specs=[
            pl.BlockSpec((tile_b, IN_FEATURES), lambda i: (i, 0)),  # x streamed over batch
            pl.BlockSpec(w1p.shape, lambda i: (0, 0)),              # weights: VMEM-resident
            pl.BlockSpec(b1p.shape, lambda i: (0, 0)),
            pl.BlockSpec(w2p.shape, lambda i: (0, 0)),
            pl.BlockSpec(b2p.shape, lambda i: (0, 0)),
        ],
        out_specs=pl.BlockSpec((tile_b, OUT_FEATURES), lambda i: (i, 0)),
        compiler_params=pltpu.CompilerParams(
            dimension_semantics=(batch_sem,),
            vmem_limit_bytes=vmem_limit_bytes,
        ),
        cost_estimate=cost,
    )(x, w1p, b1p, w2p, b2p)


def dlcm_hex_8_2_forward(x, w1p, b1p, w2p, b2p, *, tile_b=None,
                         out_dtype=jnp.float32, core_parallel=False):
    """x: (B, 24) float32; packed params from pack_params. Returns (B, 20) out_dtype."""
    B = x.shape[0]
    phys = _physical_vmem_bytes()
    if tile_b is None:
        tile_b = _default_tile_b(phys)
    # Clamp to the (8-rounded) batch so tiny batches use a single small tile.
    tile_b = max(8, min(int(tile_b), _round_up(B, 8)))
    vmem_limit = _vmem_limit_for(tile_b, phys)
    return _forward_impl(x, w1p, b1p, w2p, b2p, tile_b=tile_b,
                         vmem_limit_bytes=vmem_limit, out_dtype=out_dtype,
                         core_parallel=core_parallel)


def init_params(key):
    """Deterministic init matching PyTorch nn.Linear default U(-1/sqrt(fan_in), +).
    Weights returned already transposed to (in, out) so y = x @ W + b."""
    k1, k2, k3, k4 = jax.random.split(key, 4)
    bound1 = 1.0 / jnp.sqrt(IN_FEATURES)
    bound2 = 1.0 / jnp.sqrt(HIDDEN)
    w1 = jax.random.uniform(k1, (IN_FEATURES, HIDDEN), jnp.float32, -bound1, bound1)
    b1 = jax.random.uniform(k2, (1, HIDDEN), jnp.float32, -bound1, bound1)
    w2 = jax.random.uniform(k3, (HIDDEN, OUT_FEATURES), jnp.float32, -bound2, bound2)
    b2 = jax.random.uniform(k4, (1, OUT_FEATURES), jnp.float32, -bound2, bound2)
    return w1, b1, w2, b2


if __name__ == "__main__":
    key = jax.random.PRNGKey(0)
    kx, kp, kr = jax.random.split(key, 3)

    w1, b1, w2, b2 = init_params(kp)
    w1p, b1p, w2p, b2p = pack_params(w1, b1, w2, b2)

    def ref_forward(xv):
        h = jnp.maximum(
            jnp.matmul(xv, w1, precision=jax.lax.Precision.HIGHEST) + b1, 0.0)
        return jnp.matmul(h, w2, precision=jax.lax.Precision.HIGHEST) + b2

    # 1) Small smoke-test shape (module consumes flattened 8x3 = 24 features).
    x = jax.random.normal(kx, (8, IN_FEATURES), jnp.float32)
    out = dlcm_hex_8_2_forward(x, w1p, b1p, w2p, b2p)
    jax.block_until_ready(out)
    ref = ref_forward(x)
    assert out.shape == (8, OUT_FEATURES) and out.dtype == jnp.float32
    # All-f32 path is typically ~1e-6 off; tolerance kept conservative for MXU pass-count
    # differences between the kernel and the XLA reference.
    assert jnp.allclose(out, ref, atol=1e-2, rtol=1e-2), (
        f"max abs err {jnp.max(jnp.abs(out - ref))}")

    # 2) Ragged batch (83 rows, 32-row tiles): exercises the clipped last grid block that
    #    replaced the old wrapper-side pad/slice.
    xr = jax.random.normal(kr, (83, IN_FEATURES), jnp.float32)
    outr = dlcm_hex_8_2_forward(xr, w1p, b1p, w2p, b2p, tile_b=32)
    jax.block_until_ready(outr)
    refr = ref_forward(xr)
    assert outr.shape == (83, OUT_FEATURES)
    assert jnp.allclose(outr, refr, atol=1e-2, rtol=1e-2), (
        f"max abs err {jnp.max(jnp.abs(outr - refr))}")

    print("KERNEL_OK")
</pallas_src>

<mosaic_0001>
module attributes {stable_mosaic.version = 11 : i64} {
  func.func @_mlp_kernel(%arg0: i32, %arg1: memref<8x24xf32, #tpu.memory_space<vmem>>, %arg2: memref<24x128xf32, #tpu.memory_space<vmem>>, %arg3: memref<1x128xf32, #tpu.memory_space<vmem>>, %arg4: memref<128x20xf32, #tpu.memory_space<vmem>>, %arg5: memref<1x20xf32, #tpu.memory_space<vmem>>, %arg6: memref<8x20xf32, #tpu.memory_space<vmem>>) attributes {dimension_semantics = [#tpu.dimension_semantics<parallel>], iteration_bounds = array<i64: 1>, scalar_prefetch = 0 : i64, scratch_operands = 0 : i64, tpu.core_type = #tpu.core_type<tc>, window_params = [{transform_indices = @transform_0, window_bounds = array<i64: 8, 24>}, {pipeline_mode = #tpu.pipeline_mode<synchronous>, transform_indices = @transform_1, window_bounds = array<i64: 24, 128>}, {pipeline_mode = #tpu.pipeline_mode<synchronous>, transform_indices = @transform_2, window_bounds = array<i64: 1, 128>}, {pipeline_mode = #tpu.pipeline_mode<synchronous>, transform_indices = @transform_3, window_bounds = array<i64: 128, 20>}, {pipeline_mode = #tpu.pipeline_mode<synchronous>, transform_indices = @transform_4, window_bounds = array<i64: 1, 20>}, {transform_indices = @transform_5, window_bounds = array<i64: 8, 20>}]} {
    %c0 = arith.constant 0 : index
    %c0_0 = arith.constant 0 : index
    %0 = vector.load %arg1[%c0, %c0_0] : memref<8x24xf32, #tpu.memory_space<vmem>>, vector<8x24xf32>
    %c0_1 = arith.constant 0 : index
    %c0_2 = arith.constant 0 : index
    %1 = vector.load %arg2[%c0_1, %c0_2] : memref<24x128xf32, #tpu.memory_space<vmem>>, vector<24x128xf32>
    %cst = arith.constant dense<0.000000e+00> : vector<8x128xf32>
    %2 = tpu.matmul %0, %1, %cst {dimension_numbers = #tpu.dot_dimension_numbers<[1], [0], [0], [1], [0, 0, 1, 1], [], []>} : vector<8x24xf32>, vector<24x128xf32>, vector<8x128xf32> -> vector<8x128xf32>
    %c0_3 = arith.constant 0 : index
    %c0_4 = arith.constant 0 : index
    %3 = vector.load %arg3[%c0_3, %c0_4] : memref<1x128xf32, #tpu.memory_space<vmem>>, vector<1x128xf32>
    %4 = vector.broadcast %3 : vector<1x128xf32> to vector<8x128xf32>
    %5 = arith.addf %2, %4 : vector<8x128xf32>
    %cst_5 = arith.constant 0.000000e+00 : f32
    %6 = vector.broadcast %cst_5 : f32 to vector<8x128xf32>
    %7 = arith.maximumf %5, %6 : vector<8x128xf32>
    %c0_6 = arith.constant 0 : index
    %c0_7 = arith.constant 0 : index
    %8 = vector.load %arg4[%c0_6, %c0_7] : memref<128x20xf32, #tpu.memory_space<vmem>>, vector<128x20xf32>
    %cst_8 = arith.constant dense<0.000000e+00> : vector<8x20xf32>
    %9 = tpu.matmul %7, %8, %cst_8 {dimension_numbers = #tpu.dot_dimension_numbers<[1], [0], [0], [1], [0, 0, 1, 1], [], []>} : vector<8x128xf32>, vector<128x20xf32>, vector<8x20xf32> -> vector<8x20xf32>
    %c0_9 = arith.constant 0 : index
    %c0_10 = arith.constant 0 : index
    %10 = vector.load %arg5[%c0_9, %c0_10] : memref<1x20xf32, #tpu.memory_space<vmem>>, vector<1x20xf32>
    %11 = vector.broadcast %10 : vector<1x20xf32> to vector<8x20xf32>
    %12 = arith.addf %9, %11 : vector<8x20xf32>
    %c0_11 = arith.constant 0 : index
    %c0_12 = arith.constant 0 : index
    %13 = vector.load %arg6[%c0_11, %c0_12] : memref<8x20xf32, #tpu.memory_space<vmem>>, vector<8x20xf32>
    tpu.vector_store %arg6[%c0_11, %c0_12], %12 {strides = array<i32>} : memref<8x20xf32, #tpu.memory_space<vmem>>, vector<8x20xf32>,
    return
  }
  func.func @transform_0(%arg0: i32) -> (i32, i32) {
    %c0_i32 = arith.constant 0 : i32
    %c0_i32_0 = arith.constant 0 : i32
    return %arg0, %c0_i32 : i32, i32
  }
  func.func @transform_1(%arg0: i32) -> (i32, i32) {
    %c0_i32 = arith.constant 0 : i32
    %c0_i32_0 = arith.constant 0 : i32
    %c0_i32_1 = arith.constant 0 : i32
    return %c0_i32, %c0_i32_0 : i32, i32
  }
  func.func @transform_2(%arg0: i32) -> (i32, i32) {
    %c0_i32 = arith.constant 0 : i32
    %c0_i32_0 = arith.constant 0 : i32
    %c0_i32_1 = arith.constant 0 : i32
    return %c0_i32, %c0_i32_0 : i32, i32
  }
  func.func @transform_3(%arg0: i32) -> (i32, i32) {
    %c0_i32 = arith.constant 0 : i32
    %c0_i32_0 = arith.constant 0 : i32
    %c0_i32_1 = arith.constant 0 : i32
    return %c0_i32, %c0_i32_0 : i32, i32
  }
  func.func @transform_4(%arg0: i32) -> (i32, i32) {
    %c0_i32 = arith.constant 0 : i32
    %c0_i32_0 = arith.constant 0 : i32
    %c0_i32_1 = arith.constant 0 : i32
    return %c0_i32, %c0_i32_0 : i32, i32
  }
  func.func @transform_5(%arg0: i32) -> (i32, i32) {
    %c0_i32 = arith.constant 0 : i32
    %c0_i32_0 = arith.constant 0 : i32
    return %arg0, %c0_i32 : i32, i32
  }
}

</mosaic_0001>

<bundles_post_ra>
// kernel: _forward_impl.1
= control target key start
LH: loop header
LB: loop body
LE: loop exit
PB: predicated region body
PF: predicated region fallthrough
CT: control target
= control target key end

     0   :  { %v309_v1 = vmov 0.0   ;;  %vm310_vm0 = vmmov 0   ;;  %vm32_vm1 = vcmask 195584   ;;  %s413_s0 = inlined_call_operand.vmem [shape: f32[8,24], index: 0, kind: input, shape index: {}]   ;;  %s414_s1 = inlined_call_operand.vmem [shape: f32[24,128], index: 1, kind: input, shape index: {}]   ;;  %s415_s2 = inlined_call_operand.vmem [shape: f32[1,128], index: 2, kind: input, shape index: {}]   ;;  %s416_s3 = inlined_call_operand.vmem [shape: f32[128,20], index: 3, kind: input, shape index: {}]   ;;  %s417_s4 = inlined_call_operand.vmem [shape: f32[1,20], index: 4, kind: input, shape index: {}]   ;;  %s418_s5 = inlined_call_operand.hbm [shape: f32[8,20], index: 5, kind: output, shape index: {}]  }
   0x1   :  { %v24_v0 = vld [vmem:[%s414_s1 + $0x10] sm:$0xff]  ;;  %240 = vmatprep.subr.mxu0 %v309_v1  ;;  %v23_v2 = vld [vmem:[%s414_s1 + $0x8] sm:$0xff]  ;;  %246 = vmatprep.mubr.msk.f32.mxu0 %vm310_vm0, %v309_v1  ;;  %v122_v3 = vld [vmem:[%s416_s3 + $0x78] sm:$0xff] }
   0x2   :  { %241 = vmatpush3.msra.mxu0 %v24_v0  ;;  %249 = vmatprep.subr.mxu1 %v309_v1  ;;  %v121_v4 = vld [vmem:[%s416_s3 + $0x70] sm:$0xff]  ;;  %v22_v5 = vld [vmem:[%s414_s1] sm:$0xff]  ;;  %v120_v7 = vld [vmem:[%s416_s3 + $0x68] sm:$0xff] }
   0x3   :  { %242 = vmatprep.subr.mxu0 %v309_v1  ;;  %250 = vmatpush3.msra.mxu1 %v122_v3  ;;  %v21_v6 = vld [vmem:[%s413_s0] sm:$0xff] }
   0x4   :  { %243 = vmatpush3.msra.mxu0 %v23_v2  ;;  %251 = vmatprep.subr.mxu1 %v309_v1  ;;  %v119_v8 = vld [vmem:[%s416_s3 + $0x60] sm:$0xff] }
   0x5   :  { %244 = vmatprep.subr.mxu0 %v309_v1  ;;  %252 = vmatpush3.msra.mxu1 %v121_v4 }
   0x6   :  { %245 = vmatpush3.msra.mxu0 %v22_v5  ;;  %253 = vmatprep.subr.mxu1 %v309_v1 }
   0x7   :  { %10 = vsyncpa [#allocation3], 0  ;;  %247 = vmatmul.mubr.msk.f32.vlgmr.msra.gmra.mxu0 %vm32_vm1, %v21_v6  ;;  %254 = vmatpush3.msra.mxu1 %v120_v7  ;;  %v118_v9 = vld [vmem:[%s416_s3 + $0x58] sm:$0xff]  ;;  %v117_v10 = vld [vmem:[%s416_s3 + $0x50] sm:$0xff]  ;;  %s311_s0 = smov [#allocation2]   ;;  %vm200_vm2 = vcmask 162816  }
   0x8   :  { %255 = vmatprep.subr.mxu1 %v309_v1  ;;  %281 = vmatprep.mubr.msk.f32.mxu1 %vm310_vm0, %v309_v1  ;;  %v116_v11 = vld [vmem:[%s416_s3 + $0x48] sm:$0xff]  ;;  %v115_v12 = vld [vmem:[%s416_s3 + $0x40] sm:$0xff]  ;;  %v114_v13 = vld [vmem:[%s416_s3 + $0x38] sm:$0xff]  ;;  %s208_s9 = sshll.u32 %s311_s0, 4  ;;  %s209_s9 = int_to_ptr.vmem [resolvable:$true] %s208_s9 }
   0x9   :  { %256 = vmatpush3.msra.mxu1 %v119_v8  ;;  %v113_v14 = vld [vmem:[%s416_s3 + $0x30] sm:$0xff]  ;;  %v112_v15 = vld [vmem:[%s416_s3 + $0x28] sm:$0xff]  ;;  %v111_v16 = vld [vmem:[%s416_s3 + $0x20] sm:$0xff]  ;;  %p292_p1 = scmp.lt.s32.totalorder %s209_s9, %s209_s9 }
   0xa   :  { %257 = vmatprep.subr.mxu1 %v309_v1  ;;  %v110_v17 = vld [vmem:[%s416_s3 + $0x18] sm:$0xff]  ;;  %v109_v18 = vld [vmem:[%s416_s3 + $0x10] sm:$0xff]  ;;  %v108_v19 = vld [vmem:[%s416_s3 + $0x8] sm:$0xff] }
   0xb   :  { %258 = vmatpush3.msra.mxu1 %v118_v9  ;;  %v107_v20 = vld [vmem:[%s416_s3] sm:$0xff]  ;;  %s287_s3 = scalar_lea.vmem %s209_s9, 128 }
   0xc   :  { %259 = vmatprep.subr.mxu1 %v309_v1  ;;  %v216_v21 = vld [vmem:[%s415_s2] ss:$0 sm:$0xff]  ;;  %p288_p0 = scmp.ne.s32.totalorder %s209_s9, %s287_s3  ;;  %p293_p2 = scmp.lt.s32.totalorder %s287_s3, %s287_s3 }
   0xd   :  { %260 = vmatpush3.msra.mxu1 %v117_v10  ;;  %v218_v26 = vld [vmem:[%s417_s4] ss:$0 sm:$0xff] }
   0xe   :  { %261 = vmatprep.subr.mxu1 %v309_v1  ;;  %p294_p3 = por %p293_p2, %p292_p1 }
   0xf   :  { %262 = vmatpush3.msra.mxu1 %v116_v11 }
  0x10   :  { %263 = vmatprep.subr.mxu1 %v309_v1  ;;  %p295_p4 = pnand %p294_p3, %p288_p0 }
  0x11   :  { %264 = vmatpush3.msra.mxu1 %v115_v12 }
  0x12   :  { %265 = vmatprep.subr.mxu1 %v309_v1 }
  0x13   :  { %266 = vmatpush3.msra.mxu1 %v114_v13 }
  0x14   :  { %267 = vmatprep.subr.mxu1 %v309_v1 }
  0x15   :  { %268 = vmatpush3.msra.mxu1 %v113_v14 }
  0x16   :  { %269 = vmatprep.subr.mxu1 %v309_v1 }
  0x17   :  { %270 = vmatpush3.msra.mxu1 %v112_v15 }
  0x18   :  { %271 = vmatprep.subr.mxu1 %v309_v1 }
  0x19   :  { %272 = vmatpush3.msra.mxu1 %v111_v16 }
  0x1a   :  { %273 = vmatprep.subr.mxu1 %v309_v1 }
  0x1b   :  { %274 = vmatpush3.msra.mxu1 %v110_v17 }
  0x1c   :  { %275 = vmatprep.subr.mxu1 %v309_v1 }
  0x1d   :  { %276 = vmatpush3.msra.mxu1 %v109_v18 }
  0x1e   :  { %277 = vmatprep.subr.mxu1 %v309_v1 }
  0x1f   :  { %278 = vmatpush3.msra.mxu1 %v108_v19 }
  0x20   :  { %279 = vmatprep.subr.mxu1 %v309_v1 }
  0x21   :  { %280 = vmatpush3.msra.mxu1 %v107_v20 }
  0xc7   :  { %v102_v22 = vpop.f32.mrf.mxu0 }
  0xc8   :  { %v103_v23 = vadd.f32 %v216_v21, %v102_v22 }
  0xc9   :  { %v248_v24 = vpop.f32.mrf.mxu0 }
  0xca   :  { %v106_v25 = vmax.f32 %v103_v23, 0.0 }
  0xcc   :  { %282 = vmatmul.mubr.f32.vlgmr.msra.gmra.mxu1 %v106_v25 }
 0x18c   :  { %v196_v27 = vpop.f32.mrf.mxu1 }
 0x18d   :  { %v197_v28 = vadd.f32 %v218_v26, %v196_v27 }
 0x18e   :  { %v283_v29 = vpop.f32.mrf.mxu1 }
 0x18f   :  { %201 = vst.msk [vmem:[#allocation2] sm:$0xff] %vm200_vm2, %v197_v28 }
 0x190   :  { %298 = shalt.err (!%p295_p4)
}
 0x191   :  { %211 = dma.vmem_to_hbm [thread:$0]  %s209_s9, 128, %s418_s5, [#allocation3]  }
 0x192   :  { %307 = dma.done.wait [#allocation3], 128  }
 0x193   :  { %308 = vsyncadd [#allocation3], 4294967168 }
 0x194   :  { %215 = vsyncpa [#allocation3], 1 }

</bundles_post_ra>
